<compile_context>
chip_gen: v6e
topology: v6e:2x2x1
jax: 0.10.0
libtpu: 0.0.40
codegen_flags: <defaults>
</compile_context>

<pallas_src>
import jax
import jax.numpy as jnp
from jax import lax
from jax.experimental import pallas as pl
from jax.experimental.pallas import tpu as pltpu

# ---- static shapes (small, consistent with the module's forward) -----------
N, CIN, H, W = 2, 4, 16, 16          # each triplet input: (N, CIN, H, W)
COUT, K, PAD = 8, 3, 1               # conv: 4 -> 8 channels, 3x3, pad 1
HP, WP = H // 2, W // 2              # after 2x2 max-pool
FEAT = COUT * HP * WP                # flattened feature dim = 512
EMB = 32                             # fc output (embedding) dim

NBRANCH = 3                          # anchor / positive / negative
NS = NBRANCH * N                     # 6 batched samples
NBLK = 2                             # grid blocks (one per v7x TensorCore)
BLK = NS // NBLK                     # samples per block = 3
ROWS = 2 * HP * BLK                  # conv-GEMM rows per block = 48, order (hl, hp, n)
RHALF = HP * BLK                     # 24 rows per h-parity half
KDIM = K * (W + 2 * PAD) * CIN       # 216 contraction lanes = (ky, padded-w, cin)
NL = W * COUT                        # 128 conv-output lanes = (w, cout)
GC = HP * EMB                        # 256 expanded fc columns = (hp, emb)


# ---------------------------- Pallas kernel ---------------------------------
def _siamese_fused_kernel(lhs_ref, w2_ref, b2_ref, wh_ref, msk_ref, sel_ref,
                          msum_ref, bf_ref, out_ref):
    # conv as row-Toeplitz GEMM; output is lane-dense: lanes = (w, cout) = 128
    y = jnp.dot(lhs_ref[...], w2_ref[...], preferred_element_type=jnp.float32)
    y = jnp.maximum(y + b2_ref[...], 0.0)                      # (ROWS, 128)

    # 2x2 max-pool, w direction: partner (w+1) sits COUT lanes to the right.
    # The wrapped tail only pollutes odd-w positions, which have zero fc weight.
    y_r = jnp.concatenate([y[:, COUT:], y[:, :COUT]], axis=1)
    m1 = jnp.maximum(y, y_r)

    # 2x2 max-pool, h direction: rows are (hl, hp, n); max the two hl halves.
    m2 = jnp.maximum(m1[:RHALF, :], m1[RHALF:, :])             # (RHALF, 128)

    # fc: expanded weight (per-hp column blocks), hp-diagonal mask, then two
    # constant selection matmuls implement the NCHW flatten + row regrouping.
    g = jnp.dot(m2, wh_ref[...], preferred_element_type=jnp.float32)   # (RHALF, GC)
    g = g * msk_ref[...]
    t = jnp.dot(sel_ref[...], g, preferred_element_type=jnp.float32)   # (BLK, GC)
    out_ref[...] = (jnp.dot(t, msum_ref[...], preferred_element_type=jnp.float32)
                    + bf_ref[...])                                      # (BLK, EMB)


# ---------------------------- wrapper ----------------------------------------
def _full_spec(shape):
    return pl.BlockSpec(shape, lambda i, _s=shape: tuple(0 for _ in _s))


def _fused_forward(lhs, prep):
    w2, b2, wh, msk, sel, msum, bf = prep
    out = pl.pallas_call(
        _siamese_fused_kernel,
        out_shape=jax.ShapeDtypeStruct((NBLK, BLK, EMB), jnp.float32),
        grid=(NBLK,),
        in_specs=[pl.BlockSpec((None, ROWS, KDIM), lambda i: (i, 0, 0)),
                  _full_spec((KDIM, NL)),
                  _full_spec((1, NL)),
                  _full_spec((NL, GC)),
                  _full_spec((RHALF, GC)),
                  _full_spec((BLK, RHALF)),
                  _full_spec((GC, EMB)),
                  _full_spec((1, EMB))],
        out_specs=pl.BlockSpec((None, BLK, EMB), lambda i: (i, 0, 0)),
        compiler_params=pltpu.CompilerParams(
            dimension_semantics=("parallel",)),
    )(lhs, w2, b2, wh, msk, sel, msum, bf)
    return out.reshape(NS, EMB)


# ---------------------------- host-side prep ---------------------------------
def prepare_params(params):
    """Expand the raw conv/fc weights into the kernel's GEMM operands (done once)."""
    w_conv, b_conv, w_fc, b_fc = params          # (K,K,CIN,COUT), (COUT,), (FEAT,EMB), (EMB,)

    # row-Toeplitz conv weight: rows (ky, wpad, cin), cols (w, cout)
    w2 = jnp.zeros((K, W + 2 * PAD, CIN, W, COUT), jnp.float32)
    iw = jnp.arange(W)
    for kx in range(K):
        w2 = w2.at[:, iw + kx, :, iw, :].set(
            jnp.broadcast_to(w_conv[:, kx, :, :], (W, K, CIN, COUT)))
    w2 = w2.reshape(KDIM, NL)
    b2 = jnp.tile(b_conv, (W,)).reshape(1, NL)

    # fc weight expanded to rows (w, cout), cols (hp, emb); odd-w rows are zero
    # (those positions hold pooling garbage and are discarded).
    wf4 = w_fc.reshape(COUT, HP, WP, EMB)                     # PyTorch NCHW flatten order
    wh = jnp.zeros((W, COUT, HP, EMB), jnp.float32)
    wh = wh.at[0::2].set(jnp.transpose(wf4, (2, 0, 1, 3)))
    wh = wh.reshape(NL, GC)

    # constant 0/1 mask & selection matrices (kernel rows are hp*BLK + n)
    rows = jnp.arange(RHALF)
    cols = jnp.arange(GC)
    msk = (rows[:, None] // BLK == cols[None, :] // EMB).astype(jnp.float32)   # (RHALF, GC)
    sel = (rows[None, :] % BLK == jnp.arange(BLK)[:, None]).astype(jnp.float32)  # (BLK, RHALF)
    msum = (cols[:, None] % EMB == jnp.arange(EMB)[None, :]).astype(jnp.float32)  # (GC, EMB)
    bf = b_fc.reshape(1, EMB)
    return w2, b2, wh, msk, sel, msum, bf


def _build_lhs(x_all):
    """Per-call layout glue: batched NCHW input -> (NBLK, ROWS, KDIM) conv-GEMM rows."""
    xh = jnp.transpose(x_all, (0, 2, 3, 1)).astype(jnp.float32)       # NCHW -> NHWC
    xp = jnp.pad(xh, ((0, 0), (PAD, PAD), (PAD, PAD), (0, 0)))        # (NS, 18, 18, CIN)
    taps = jnp.stack([xp[:, ky:ky + H, :, :] for ky in range(K)], axis=2)  # (NS,H,K,W+2,CIN)
    a = taps.reshape(NBLK, BLK, HP, 2, K, W + 2 * PAD, CIN)           # split h -> (hp, hl)
    a = jnp.transpose(a, (0, 3, 2, 1, 4, 5, 6))                       # (blk, hl, hp, n, ...)
    return a.reshape(NBLK, ROWS, KDIM)


@jax.jit
def siamese_forward(anchor, positive, negative, prep):
    x_all = jnp.concatenate([anchor, positive, negative], axis=0)     # (NS, CIN, H, W)
    lhs = _build_lhs(x_all)
    out = _fused_forward(lhs, prep)                                   # (NS, EMB)
    return out[0:N], out[N:2 * N], out[2 * N:3 * N]


# ---------------------------- pure-JAX reference ------------------------------
def forward_one_ref(x_nchw, params):
    w_conv, b_conv, w_fc, b_fc = params
    n = x_nchw.shape[0]
    x = jnp.transpose(x_nchw, (0, 2, 3, 1)).astype(jnp.float32)
    y = lax.conv_general_dilated(x, w_conv, (1, 1), ((PAD, PAD), (PAD, PAD)),
                                 dimension_numbers=("NHWC", "HWIO", "NHWC"))
    y = jnp.maximum(y + b_conv, 0.0)
    p = lax.reduce_window(y, -jnp.inf, lax.max,
                          (1, 2, 2, 1), (1, 2, 2, 1), "VALID")
    flat = jnp.transpose(p, (0, 3, 1, 2)).reshape(n, FEAT)            # PyTorch .view(N, -1)
    return flat @ w_fc + b_fc


def init_params(key):
    k1, k2, k3, k4 = jax.random.split(key, 4)
    # NOTE: PyTorch stores conv weight as (COUT, CIN, K, K) and Linear as (out, in);
    # here the (K, K, CIN, COUT) / (FEAT, EMB) layouts are the transposed equivalents.
    w_conv = jax.random.normal(k1, (K, K, CIN, COUT), jnp.float32) * 0.1
    b_conv = jax.random.normal(k2, (COUT,), jnp.float32) * 0.1
    w_fc = jax.random.normal(k3, (FEAT, EMB), jnp.float32) * 0.05
    b_fc = jax.random.normal(k4, (EMB,), jnp.float32) * 0.05
    return w_conv, b_conv, w_fc, b_fc


if __name__ == "__main__":
    root = jax.random.PRNGKey(0)
    kp, ka, kpz, kn = jax.random.split(root, 4)
    params = init_params(kp)
    prep = prepare_params(params)            # weight expansion hoisted out of the hot path

    anchor = jax.random.normal(ka, (N, CIN, H, W), jnp.float32)
    positive = jax.random.normal(kpz, (N, CIN, H, W), jnp.float32)
    negative = jax.random.normal(kn, (N, CIN, H, W), jnp.float32)

    out_a, out_p, out_n = siamese_forward(anchor, positive, negative, prep)
    jax.block_until_ready((out_a, out_p, out_n))

    ref_a = forward_one_ref(anchor, params)
    ref_p = forward_one_ref(positive, params)
    ref_n = forward_one_ref(negative, params)
    for got, ref in ((out_a, ref_a), (out_p, ref_p), (out_n, ref_n)):
        assert got.shape == (N, EMB) and got.dtype == jnp.float32
        assert jnp.allclose(got, ref, atol=2e-3, rtol=2e-3), "mismatch vs reference"

    print("KERNEL_OK")
</pallas_src>

<mosaic_0001>
module attributes {stable_mosaic.version = 11 : i64} {
  func.func @_siamese_fused_kernel(%arg0: i32, %arg1: memref<1x48x216xf32, #tpu.memory_space<vmem>>, %arg2: memref<216x128xf32, #tpu.memory_space<vmem>>, %arg3: memref<1x128xf32, #tpu.memory_space<vmem>>, %arg4: memref<128x256xf32, #tpu.memory_space<vmem>>, %arg5: memref<24x256xf32, #tpu.memory_space<vmem>>, %arg6: memref<3x24xf32, #tpu.memory_space<vmem>>, %arg7: memref<256x32xf32, #tpu.memory_space<vmem>>, %arg8: memref<1x32xf32, #tpu.memory_space<vmem>>, %arg9: memref<1x3x32xf32, #tpu.memory_space<vmem>>) attributes {dimension_semantics = [#tpu.dimension_semantics<parallel>], iteration_bounds = array<i64: 2>, scalar_prefetch = 0 : i64, scratch_operands = 0 : i64, tpu.core_type = #tpu.core_type<tc>, window_params = [{transform_indices = @transform_0, window_bounds = array<i64: 1, 48, 216>}, {pipeline_mode = #tpu.pipeline_mode<synchronous>, transform_indices = @transform_1, window_bounds = array<i64: 216, 128>}, {pipeline_mode = #tpu.pipeline_mode<synchronous>, transform_indices = @transform_2, window_bounds = array<i64: 1, 128>}, {pipeline_mode = #tpu.pipeline_mode<synchronous>, transform_indices = @transform_3, window_bounds = array<i64: 128, 256>}, {pipeline_mode = #tpu.pipeline_mode<synchronous>, transform_indices = @transform_4, window_bounds = array<i64: 24, 256>}, {pipeline_mode = #tpu.pipeline_mode<synchronous>, transform_indices = @transform_5, window_bounds = array<i64: 3, 24>}, {pipeline_mode = #tpu.pipeline_mode<synchronous>, transform_indices = @transform_6, window_bounds = array<i64: 256, 32>}, {pipeline_mode = #tpu.pipeline_mode<synchronous>, transform_indices = @transform_7, window_bounds = array<i64: 1, 32>}, {transform_indices = @transform_8, window_bounds = array<i64: 1, 3, 32>}]} {
    %c0 = arith.constant 0 : index
    %c0_0 = arith.constant 0 : index
    %c0_1 = arith.constant 0 : index
    %0 = vector.load %arg1[%c0, %c0_0, %c0_1] : memref<1x48x216xf32, #tpu.memory_space<vmem>>, vector<1x48x216xf32>
    %1 = vector.shape_cast %0 : vector<1x48x216xf32> to vector<48x216xf32>
    %c0_2 = arith.constant 0 : index
    %c0_3 = arith.constant 0 : index
    %2 = vector.load %arg2[%c0_2, %c0_3] : memref<216x128xf32, #tpu.memory_space<vmem>>, vector<216x128xf32>
    %cst = arith.constant dense<0.000000e+00> : vector<48x128xf32>
    %3 = tpu.matmul %1, %2, %cst {dimension_numbers = #tpu.dot_dimension_numbers<[1], [0], [0], [1], [0, 0, 1, 1], [], []>} : vector<48x216xf32>, vector<216x128xf32>, vector<48x128xf32> -> vector<48x128xf32>
    %c0_4 = arith.constant 0 : index
    %c0_5 = arith.constant 0 : index
    %4 = vector.load %arg3[%c0_4, %c0_5] : memref<1x128xf32, #tpu.memory_space<vmem>>, vector<1x128xf32>
    %5 = vector.broadcast %4 : vector<1x128xf32> to vector<48x128xf32>
    %6 = arith.addf %3, %5 : vector<48x128xf32>
    %cst_6 = arith.constant 0.000000e+00 : f32
    %7 = vector.broadcast %cst_6 : f32 to vector<48x128xf32>
    %8 = arith.maximumf %6, %7 : vector<48x128xf32>
    %9 = vector.extract_strided_slice %8 {offsets = [0, 8], sizes = [48, 120], strides = [1, 1]} : vector<48x128xf32> to vector<48x120xf32>
    %10 = vector.extract_strided_slice %8 {offsets = [0, 0], sizes = [48, 8], strides = [1, 1]} : vector<48x128xf32> to vector<48x8xf32>
    %11 = tpu.concatenate %9, %10 in 1 : vector<48x120xf32>, vector<48x8xf32> -> vector<48x128xf32>
    %12 = arith.maximumf %8, %11 : vector<48x128xf32>
    %13 = vector.extract_strided_slice %12 {offsets = [0, 0], sizes = [24, 128], strides = [1, 1]} : vector<48x128xf32> to vector<24x128xf32>
    %14 = vector.extract_strided_slice %12 {offsets = [24, 0], sizes = [24, 128], strides = [1, 1]} : vector<48x128xf32> to vector<24x128xf32>
    %15 = arith.maximumf %13, %14 : vector<24x128xf32>
    %c0_7 = arith.constant 0 : index
    %c0_8 = arith.constant 0 : index
    %16 = vector.load %arg4[%c0_7, %c0_8] : memref<128x256xf32, #tpu.memory_space<vmem>>, vector<128x256xf32>
    %cst_9 = arith.constant dense<0.000000e+00> : vector<24x256xf32>
    %17 = tpu.matmul %15, %16, %cst_9 {dimension_numbers = #tpu.dot_dimension_numbers<[1], [0], [0], [1], [0, 0, 1, 1], [], []>} : vector<24x128xf32>, vector<128x256xf32>, vector<24x256xf32> -> vector<24x256xf32>
    %c0_10 = arith.constant 0 : index
    %c0_11 = arith.constant 0 : index
    %18 = vector.load %arg5[%c0_10, %c0_11] : memref<24x256xf32, #tpu.memory_space<vmem>>, vector<24x256xf32>
    %19 = arith.mulf %17, %18 : vector<24x256xf32>
    %c0_12 = arith.constant 0 : index
    %c0_13 = arith.constant 0 : index
    %20 = vector.load %arg6[%c0_12, %c0_13] : memref<3x24xf32, #tpu.memory_space<vmem>>, vector<3x24xf32>
    %cst_14 = arith.constant dense<0.000000e+00> : vector<3x256xf32>
    %21 = tpu.matmul %20, %19, %cst_14 {dimension_numbers = #tpu.dot_dimension_numbers<[1], [0], [0], [1], [0, 0, 1, 1], [], []>} : vector<3x24xf32>, vector<24x256xf32>, vector<3x256xf32> -> vector<3x256xf32>
    %c0_15 = arith.constant 0 : index
    %c0_16 = arith.constant 0 : index
    %22 = vector.load %arg7[%c0_15, %c0_16] : memref<256x32xf32, #tpu.memory_space<vmem>>, vector<256x32xf32>
    %cst_17 = arith.constant dense<0.000000e+00> : vector<3x32xf32>
    %23 = tpu.matmul %21, %22, %cst_17 {dimension_numbers = #tpu.dot_dimension_numbers<[1], [0], [0], [1], [0, 0, 1, 1], [], []>} : vector<3x256xf32>, vector<256x32xf32>, vector<3x32xf32> -> vector<3x32xf32>
    %c0_18 = arith.constant 0 : index
    %c0_19 = arith.constant 0 : index
    %24 = vector.load %arg8[%c0_18, %c0_19] : memref<1x32xf32, #tpu.memory_space<vmem>>, vector<1x32xf32>
    %25 = vector.broadcast %24 : vector<1x32xf32> to vector<3x32xf32>
    %26 = arith.addf %23, %25 : vector<3x32xf32>
    %c0_20 = arith.constant 0 : index
    %c0_21 = arith.constant 0 : index
    %c0_22 = arith.constant 0 : index
    %27 = vector.load %arg9[%c0_20, %c0_21, %c0_22] : memref<1x3x32xf32, #tpu.memory_space<vmem>>, vector<1x3x32xf32>
    %28 = vector.shape_cast %27 : vector<1x3x32xf32> to vector<3x32xf32>
    %29 = vector.shape_cast %26 : vector<3x32xf32> to vector<1x3x32xf32>
    tpu.vector_store %arg9[%c0_20, %c0_21, %c0_22], %29 {strides = array<i32>} : memref<1x3x32xf32, #tpu.memory_space<vmem>>, vector<1x3x32xf32>,
    return
  }
  func.func @transform_0(%arg0: i32) -> (i32, i32, i32) {
    %c0_i32 = arith.constant 0 : i32
    %c0_i32_0 = arith.constant 0 : i32
    %c0_i32_1 = arith.constant 0 : i32
    return %arg0, %c0_i32, %c0_i32_0 : i32, i32, i32
  }
  func.func @transform_1(%arg0: i32) -> (i32, i32) {
    %c0_i32 = arith.constant 0 : i32
    %c0_i32_0 = arith.constant 0 : i32
    %c0_i32_1 = arith.constant 0 : i32
    return %c0_i32, %c0_i32_0 : i32, i32
  }
  func.func @transform_2(%arg0: i32) -> (i32, i32) {
    %c0_i32 = arith.constant 0 : i32
    %c0_i32_0 = arith.constant 0 : i32
    %c0_i32_1 = arith.constant 0 : i32
    return %c0_i32, %c0_i32_0 : i32, i32
  }
  func.func @transform_3(%arg0: i32) -> (i32, i32) {
    %c0_i32 = arith.constant 0 : i32
    %c0_i32_0 = arith.constant 0 : i32
    %c0_i32_1 = arith.constant 0 : i32
    return %c0_i32, %c0_i32_0 : i32, i32
  }
  func.func @transform_4(%arg0: i32) -> (i32, i32) {
    %c0_i32 = arith.constant 0 : i32
    %c0_i32_0 = arith.constant 0 : i32
    %c0_i32_1 = arith.constant 0 : i32
    return %c0_i32, %c0_i32_0 : i32, i32
  }
  func.func @transform_5(%arg0: i32) -> (i32, i32) {
    %c0_i32 = arith.constant 0 : i32
    %c0_i32_0 = arith.constant 0 : i32
    %c0_i32_1 = arith.constant 0 : i32
    return %c0_i32, %c0_i32_0 : i32, i32
  }
  func.func @transform_6(%arg0: i32) -> (i32, i32) {
    %c0_i32 = arith.constant 0 : i32
    %c0_i32_0 = arith.constant 0 : i32
    %c0_i32_1 = arith.constant 0 : i32
    return %c0_i32, %c0_i32_0 : i32, i32
  }
  func.func @transform_7(%arg0: i32) -> (i32, i32) {
    %c0_i32 = arith.constant 0 : i32
    %c0_i32_0 = arith.constant 0 : i32
    %c0_i32_1 = arith.constant 0 : i32
    return %c0_i32, %c0_i32_0 : i32, i32
  }
  func.func @transform_8(%arg0: i32) -> (i32, i32, i32) {
    %c0_i32 = arith.constant 0 : i32
    %c0_i32_0 = arith.constant 0 : i32
    %c0_i32_1 = arith.constant 0 : i32
    return %arg0, %c0_i32, %c0_i32_0 : i32, i32, i32
  }
}

</mosaic_0001>

<bundles_post_ra>
// kernel: siamese_forward.1
= control target key start
LH: loop header
LB: loop body
LE: loop exit
PB: predicated region body
PF: predicated region fallthrough
CT: control target
= control target key end

     0   :  { %s1004_s27 = smov 0   ;;  %s1376_s0 = inlined_call_operand.vmem [shape: f32[2,48,216], index: 0, kind: input, shape index: {}]   ;;  %s1377_s1 = inlined_call_operand.vmem [shape: f32[216,128], index: 1, kind: input, shape index: {}]   ;;  %s1378_s2 = inlined_call_operand.vmem [shape: f32[1,128], index: 2, kind: input, shape index: {}]   ;;  %s1379_s3 = inlined_call_operand.vmem [shape: f32[128,256], index: 3, kind: input, shape index: {}]   ;;  %s1380_s4 = inlined_call_operand.vmem [shape: f32[24,256], index: 4, kind: input, shape index: {}]   ;;  %s1381_s5 = inlined_call_operand.vmem [shape: f32[3,24], index: 5, kind: input, shape index: {}]   ;;  %s1382_s6 = inlined_call_operand.vmem [shape: f32[256,32], index: 6, kind: input, shape index: {}]   ;;  %s1383_s7 = inlined_call_operand.vmem [shape: f32[1,32], index: 7, kind: input, shape index: {}]   ;;  %s1384_s8 = inlined_call_operand.vmem [shape: f32[2,3,32], index: 8, kind: output, shape index: {}]  }
   0x1 LB: > { %s870_s28 = sadd.s32 4294967295, %s955_s27   ;;  %p874_p0 = scmp.ge.s32.totalorder %s955_s27, 1  ;;  %s955_s27 = sphi %s1004_s27, %s18_s27  }
   0x2   : > { %p262_p1 = scmp.lt.s32.totalorder %s955_s27, 3 }
   0x4   : > { %p263_p2 = pnand %p874_p0, %p262_p1 }
   0x5   : > { %p295_p3 = scmp.lt.s32.totalorder (!%p263_p2), %s870_s28, 1 }
   0x6   : > { %266 = sbr.rel (%p263_p2) target bundleno = 1005 (0x3ed), region = 52 }
   0xb   : > { %v331_v0 = vld [vmem:[%s1377_s1 + $0x78] sm:$0xff]  ;;  %v957_v1 = vmov 0.0   ;;  %v330_v2 = vld [vmem:[%s1377_s1 + $0x70] sm:$0xff]  ;;  %s1386_s28 = smov (!%p295_p3, %s870_s28), 1  ;;  %v329_v3 = vld [vmem:[%s1377_s1 + $0x68] sm:$0xff]  ;;  %vm350_vm0 = vcmask 719872  }
   0xc   : > { %369 = vmatprep.subr.mxu0 %v957_v1  ;;  %599 = vmatprep.mubr.f32.mxu1 %v957_v1  ;;  %s923_s13 = smul.u32 96, %s1386_s28  ;;  %v328_v4 = vld [vmem:[%s1377_s1 + $0x60] sm:$0xff]  ;;  %v327_v5 = vld [vmem:[%s1377_s1 + $0x58] sm:$0xff]  ;;  %v326_v6 = vld [vmem:[%s1377_s1 + $0x50] sm:$0xff]  ;;  %vm631_vm1 = vcmask 195584   ;;  %s876_s12 = sshll.u32 %s1386_s28, 2 }
   0xd   : > { %370 = vmatpush1.msra.mxu0 %v331_v0  ;;  %v325_v8 = vld [vmem:[%s1377_s1 + $0x48] sm:$0xff]  ;;  %v324_v9 = vld [vmem:[%s1377_s1 + $0x40] sm:$0xff]  ;;  %v323_v10 = vld [vmem:[%s1377_s1 + $0x38] sm:$0xff]  ;;  %s303_s16 = scalar_lea.vmem %s1384_s8, %s876_s12  ;;  %vm815_vm2 = vcmask 256000  }
   0xe   : > { %371 = vmatprep.subr.mxu0 %v957_v1  ;;  %s1034_s18 = scalar_lea.vmem %s1376_s0, %s923_s13  ;;  %v322_v11 = vld [vmem:[%s1377_s1 + $0x30] sm:$0xff]  ;;  %v321_v12 = vld [vmem:[%s1377_s1 + $0x28] sm:$0xff]  ;;  %v320_v13 = vld [vmem:[%s1377_s1 + $0x20] sm:$0xff]  ;;  %s958_s13 = smov 120  }
   0xf   : > { %372 = vmatpush1.msra.mxu0 %v330_v2  ;;  %v305_v7 = vld [vmem:[%s1034_s18 + $0x8] sm:$0xff]  ;;  %v319_v14 = vld [vmem:[%s1377_s1 + $0x18] sm:$0xff]  ;;  %v318_v15 = vld [vmem:[%s1377_s1 + $0x10] sm:$0xff] }
  0x10   : > { %373 = vmatprep.subr.mxu0 %v957_v1  ;;  %878 = vmatprep.mubr.msk.f32.mxu0 %vm350_vm0, %v305_v7  ;;  %v317_v16 = vld [vmem:[%s1377_s1 + $0x8] sm:$0xff]  ;;  %v316_v17 = vld [vmem:[%s1377_s1] sm:$0xff]  ;;  %v342_v18 = vld [vmem:[%s1377_s1 + $0xd0] sm:$0xff] }
  0x11   : > { %374 = vmatpush1.msra.mxu0 %v329_v3  ;;  %v341_v19 = vld [vmem:[%s1377_s1 + $0xc8] sm:$0xff]  ;;  %v340_v20 = vld [vmem:[%s1377_s1 + $0xc0] sm:$0xff]  ;;  %v339_v21 = vld [vmem:[%s1377_s1 + $0xb8] sm:$0xff] }
  0x12   : > { %375 = vmatprep.subr.mxu0 %v957_v1  ;;  %v338_v22 = vld [vmem:[%s1377_s1 + $0xb0] sm:$0xff]  ;;  %v337_v23 = vld [vmem:[%s1377_s1 + $0xa8] sm:$0xff]  ;;  %v336_v24 = vld [vmem:[%s1377_s1 + $0xa0] sm:$0xff] }
  0x13   : > { %376 = vmatpush1.msra.mxu0 %v328_v4  ;;  %v335_v25 = vld [vmem:[%s1377_s1 + $0x98] sm:$0xff]  ;;  %v334_v26 = vld [vmem:[%s1377_s1 + $0x90] sm:$0xff]  ;;  %v333_v27 = vld [vmem:[%s1377_s1 + $0x88] sm:$0xff] }
  0x14   : > { %377 = vmatprep.subr.mxu0 %v957_v1  ;;  %v332_v28 = vld [vmem:[%s1377_s1 + $0x80] sm:$0xff]  ;;  %v307_v30 = vld [vmem:[%s1034_s18 + $0x18] sm:$0xff]  ;;  %v306_v31 = vld [vmem:[%s1034_s18 + $0x10] sm:$0xff] }
  0x15   : > { %378 = vmatpush1.msra.mxu0 %v327_v5  ;;  %v304_v29 = vld [vmem:[%s1034_s18] sm:$0xff]  ;;  %v309_v32 = vld [vmem:[%s1034_s18 + $0x28] sm:$0xff]  ;;  %v311_v34 = vld [vmem:[%s1034_s18 + $0x38] sm:$0xff] }
  0x16   : > { %379 = vmatprep.subr.mxu0 %v957_v1  ;;  %v308_v33 = vld [vmem:[%s1034_s18 + $0x20] sm:$0xff]  ;;  %v310_v35 = vld [vmem:[%s1034_s18 + $0x30] sm:$0xff]  ;;  %v313_v36 = vld [vmem:[%s1034_s18 + $0x48] sm:$0xff] }
  0x17   : > { %380 = vmatpush1.msra.mxu0 %v326_v6  ;;  %v312_v37 = vld [vmem:[%s1034_s18 + $0x40] sm:$0xff]  ;;  %v315_v38 = vld [vmem:[%s1034_s18 + $0x58] sm:$0xff]  ;;  %v314_v39 = vld [vmem:[%s1034_s18 + $0x50] sm:$0xff] }
  0x18   : > { %381 = vmatprep.subr.mxu0 %v957_v1  ;;  %v534_v40 = vld [vmem:[%s1379_s3 + $0xf8] sm:$0xff]  ;;  %v533_v41 = vld [vmem:[%s1379_s3 + $0xf0] sm:$0xff]  ;;  %v532_v42 = vld [vmem:[%s1379_s3 + $0xe8] sm:$0xff] }
  0x19   : > { %382 = vmatpush1.msra.mxu0 %v325_v8  ;;  %535 = vmatprep.subr.mxu1 %v534_v40  ;;  %v531_v43 = vld [vmem:[%s1379_s3 + $0xe0] sm:$0xff]  ;;  %v530_v44 = vld [vmem:[%s1379_s3 + $0xd8] sm:$0xff]  ;;  %v529_v45 = vld [vmem:[%s1379_s3 + $0xd0] sm:$0xff] }
  0x1a   : > { %383 = vmatprep.subr.mxu0 %v957_v1  ;;  %536 = vmatpush1.msra.mxu1 %v533_v41  ;;  %v528_v46 = vld [vmem:[%s1379_s3 + $0xc8] sm:$0xff]  ;;  %v527_v47 = vld [vmem:[%s1379_s3 + $0xc0] sm:$0xff]  ;;  %v526_v48 = vld [vmem:[%s1379_s3 + $0xb8] sm:$0xff] }
  0x1b   : > { %384 = vmatpush1.msra.mxu0 %v324_v9  ;;  %537 = vmatprep.subr.mxu1 %v532_v42  ;;  %v525_v49 = vld [vmem:[%s1379_s3 + $0xb0] sm:$0xff]  ;;  %v524_v50 = vld [vmem:[%s1379_s3 + $0xa8] sm:$0xff]  ;;  %v523_v51 = vld [vmem:[%s1379_s3 + $0xa0] sm:$0xff] }
  0x1c   : > { %385 = vmatprep.subr.mxu0 %v957_v1  ;;  %538 = vmatpush1.msra.mxu1 %v531_v43  ;;  %v522_v52 = vld [vmem:[%s1379_s3 + $0x98] sm:$0xff]  ;;  %v521_v53 = vld [vmem:[%s1379_s3 + $0x90] sm:$0xff]  ;;  %v520_v54 = vld [vmem:[%s1379_s3 + $0x88] sm:$0xff] }
  0x1d   : > { %386 = vmatpush1.msra.mxu0 %v323_v10  ;;  %539 = vmatprep.subr.mxu1 %v530_v44  ;;  %v519_v55 = vld [vmem:[%s1379_s3 + $0x80] sm:$0xff]  ;;  %v518_v56 = vld [vmem:[%s1379_s3 + $0x78] sm:$0xff]  ;;  %v517_v57 = vld [vmem:[%s1379_s3 + $0x70] sm:$0xff] }
  0x1e   : > { %387 = vmatprep.subr.mxu0 %v957_v1  ;;  %540 = vmatpush1.msra.mxu1 %v529_v45  ;;  %v516_v58 = vld [vmem:[%s1379_s3 + $0x68] sm:$0xff]  ;;  %v515_v59 = vld [vmem:[%s1379_s3 + $0x60] sm:$0xff]  ;;  %v514_v60 = vld [vmem:[%s1379_s3 + $0x58] sm:$0xff] }
  0x1f   : > { %388 = vmatpush1.msra.mxu0 %v322_v11  ;;  %541 = vmatprep.subr.mxu1 %v528_v46  ;;  %v513_v61 = vld [vmem:[%s1379_s3 + $0x50] sm:$0xff]  ;;  %v512_v62 = vld [vmem:[%s1379_s3 + $0x48] sm:$0xff]  ;;  %v511_v63 = vld [vmem:[%s1379_s3 + $0x40] sm:$0xff] }
  0x20   : > { %389 = vmatprep.subr.mxu0 %v957_v1  ;;  %542 = vmatpush1.msra.mxu1 %v527_v47  ;;  %v510_v0 = vld [vmem:[%s1379_s3 + $0x38] sm:$0xff]  ;;  %v509_v2 = vld [vmem:[%s1379_s3 + $0x30] sm:$0xff]  ;;  %v508_v6 = vld [vmem:[%s1379_s3 + $0x28] sm:$0xff] }
  0x21   : > { %390 = vmatpush1.msra.mxu0 %v321_v12  ;;  %543 = vmatprep.subr.mxu1 %v526_v48  ;;  %v507_v8 = vld [vmem:[%s1379_s3 + $0x20] sm:$0xff]  ;;  %v506_v9 = vld [vmem:[%s1379_s3 + $0x18] sm:$0xff]  ;;  %v505_v12 = vld [vmem:[%s1379_s3 + $0x10] sm:$0xff] }
  0x22   : > { %391 = vmatprep.subr.mxu0 %v957_v1  ;;  %544 = vmatpush1.msra.mxu1 %v525_v49  ;;  %v877_v10 = vld [vmem:[%s1378_s2] ss:$0 sm:$0xff] }
  0x23   : > { %392 = vmatpush1.msra.mxu0 %v320_v13  ;;  %545 = vmatprep.subr.mxu1 %v524_v50  ;;  %v504_v13 = vld [vmem:[%s1379_s3 + $0x8] sm:$0xff] }
  0x24   : > { %393 = vmatprep.subr.mxu0 %v957_v1  ;;  %546 = vmatpush1.msra.mxu1 %v523_v51 }
  0x25   : > { %394 = vmatpush1.msra.mxu0 %v319_v14  ;;  %547 = vmatprep.subr.mxu1 %v522_v52 }
  0x26   : > { %395 = vmatprep.subr.mxu0 %v957_v1  ;;  %548 = vmatpush1.msra.mxu1 %v521_v53 }
  0x27   : > { %396 = vmatpush1.msra.mxu0 %v318_v15  ;;  %549 = vmatprep.subr.mxu1 %v520_v54  ;;  %v503_v15 = vld [vmem:[%s1379_s3] sm:$0xff] }
  0x28   : > { %397 = vmatprep.subr.mxu0 %v957_v1  ;;  %550 = vmatpush1.msra.mxu1 %v519_v55 }
  0x29   : > { %398 = vmatpush1.msra.mxu0 %v317_v16  ;;  %551 = vmatprep.subr.mxu1 %v518_v56 }
  0x2a   : > { %399 = vmatprep.subr.mxu0 %v957_v1  ;;  %552 = vmatpush1.msra.mxu1 %v517_v57 }
  0x2b   : > { %400 = vmatpush1.msra.mxu0 %v316_v17  ;;  %553 = vmatprep.subr.mxu1 %v516_v58 }
  0x2c   : > { %411 = vmatprep.subr.mxu0 %v957_v1  ;;  %554 = vmatpush1.msra.mxu1 %v515_v59 }
  0x2d   : > { %412 = vmatpush2.msra.mxu0 %v342_v18  ;;  %555 = vmatprep.subr.mxu1 %v514_v60  ;;  %v623_v60 = vld [vmem:[%s1380_s4 + $0x28] sm:$0xff] }
  0x2e   : > { %413 = vmatprep.subr.mxu0 %v957_v1  ;;  %556 = vmatpush1.msra.mxu1 %v513_v61  ;;  %v622_v61 = vld [vmem:[%s1380_s4 + $0x20] sm:$0xff] }
  0x2f   : > { %414 = vmatpush2.msra.mxu0 %v341_v19  ;;  %557 = vmatprep.subr.mxu1 %v512_v62  ;;  %v621_v62 = vld [vmem:[%s1380_s4 + $0x18] sm:$0xff] }
  0x30   : > { %415 = vmatprep.subr.mxu0 %v957_v1  ;;  %558 = vmatpush1.msra.mxu1 %v511_v63 }
  0x31   : > { %416 = vmatpush2.msra.mxu0 %v340_v20  ;;  %559 = vmatprep.subr.mxu1 %v510_v0 }
  0x32   : > { %417 = vmatprep.subr.mxu0 %v957_v1  ;;  %560 = vmatpush1.msra.mxu1 %v509_v2  ;;  %v619_v2 = vld [vmem:[%s1380_s4 + $0x8] sm:$0xff] }
  0x33   : > { %418 = vmatpush2.msra.mxu0 %v339_v21  ;;  %561 = vmatprep.subr.mxu1 %v508_v6 }
  0x34   : > { %419 = vmatprep.subr.mxu0 %v957_v1  ;;  %562 = vmatpush1.msra.mxu1 %v507_v8 }
  0x35   : > { %420 = vmatpush2.msra.mxu0 %v338_v22  ;;  %563 = vmatprep.subr.mxu1 %v506_v9  ;;  %v630_v9 = vld [vmem:[%s1381_s5] sm:$0x7] }
  0x36   : > { %421 = vmatprep.subr.mxu0 %v957_v1  ;;  %564 = vmatpush1.msra.mxu1 %v505_v12  ;;  %v736_v12 = vld [vmem:[%s1382_s6 + $0xf0] sm:$0xff] }
  0x37   : > { %422 = vmatpush2.msra.mxu0 %v337_v23  ;;  %565 = vmatprep.subr.mxu1 %v504_v13  ;;  %v720_v13 = vld [vmem:[%s1382_s6 + $0x70] sm:$0xff] }
  0x38   : > { %423 = vmatprep.subr.mxu0 %v957_v1  ;;  %566 = vmatpush1.msra.mxu1 %v503_v15  ;;  %v719_v15 = vld [vmem:[%s1382_s6 + $0x68] sm:$0xff] }
  0x39   : > { %424 = vmatpush2.msra.mxu0 %v336_v24 }
  0x3a   : > { %425 = vmatprep.subr.mxu0 %v957_v1 }
  0x3b   : > { %426 = vmatpush2.msra.mxu0 %v335_v25 }
  0x3c   : > { %427 = vmatprep.subr.mxu0 %v957_v1 }
  0x3d   : > { %428 = vmatpush2.msra.mxu0 %v334_v26 }
  0x3e   : > { %429 = vmatprep.subr.mxu0 %v957_v1 }
  0x3f   : > { %430 = vmatpush2.msra.mxu0 %v333_v27 }
  0x40   : > { %431 = vmatprep.subr.mxu0 %v957_v1 }
  0x41   : > { %432 = vmatpush2.msra.mxu0 %v332_v28 }
  0x42   : > { %434 = vmatmul.mubr.f32.vlgmr.msra.gmra.mxu0 %v304_v29 }
  0x43   : > { %879 = vmatprep.mubr.msk.f32.mxu0 %vm350_vm0, %v307_v30 }
  0x46   : > { %439 = vmatmul.mubr.f32.gmra.mxu0 %v306_v31 }
  0x47   : > { %880 = vmatprep.mubr.msk.f32.mxu0 %vm350_vm0, %v309_v32 }
  0x4a   : > { %444 = vmatmul.mubr.f32.gmra.mxu0 %v308_v33 }
  0x4b   : > { %881 = vmatprep.mubr.msk.f32.mxu0 %vm350_vm0, %v311_v34 }
  0x4e   : > { %449 = vmatmul.mubr.f32.gmra.mxu0 %v310_v35 }
  0x4f   : > { %882 = vmatprep.mubr.msk.f32.mxu0 %vm350_vm0, %v313_v36 }
  0x52   : > { %454 = vmatmul.mubr.f32.gmra.mxu0 %v312_v37 }
  0x53   : > { %883 = vmatprep.mubr.msk.f32.mxu0 %vm350_vm0, %v315_v38 }
  0x56   : > { %459 = vmatmul.mubr.f32.gmra.mxu0 %v314_v39 }
 0x102   : > { %v435_v3 = vpop.f32.mrf.mxu0 }
 0x103   : > { %v436_v16 = vadd.f32 %v877_v10, %v435_v3 }
 0x104   : > { %v437_v4 = vpop.f32.mrf.mxu0 }
 0x105   : > { %v464_v20 = vmax.f32 %v436_v16, 0.0  ;;  %v618_v4 = vld [vmem:[%s1380_s4] sm:$0xff] }
 0x106   : > { %v440_v5 = vpop.f32.mrf.mxu0  ;;  %v734_v16 = vld [vmem:[%s1382_s6 + $0xe0] sm:$0xff] }
 0x107   : > { %v441_v21 = vadd.f32 %v877_v10, %v440_v5 }
 0x108   : > { %v442_v7 = vpop.f32.mrf.mxu0 }
 0x109   : > { %v465_v27 = vmax.f32 %v441_v21, 0.0  ;;  %v716_v21 = vld [vmem:[%s1382_s6 + $0x50] sm:$0xff] }
 0x10a   : > { %v445_v11 = vpop.f32.mrf.mxu0 }
 0x10b   : > { %v446_v28 = vadd.f32 %v877_v10, %v445_v11  ;;  %v721_v11 = vld [vmem:[%s1382_s6 + $0x78] sm:$0xff] }
 0x10c   : > { %v447_v14 = vpop.f32.mrf.mxu0 }
 0x10d   : > { %v466_v34 = vmax.f32 %v446_v28, 0.0  ;;  %v735_v14 = vld [vmem:[%s1382_s6 + $0xe8] sm:$0xff]  ;;  %v728_v28 = vld [vmem:[%s1382_s6 + $0xb0] sm:$0xff] }
 0x10e   : > { %v450_v17 = vpop.f32.mrf.mxu0 }
 0x10f   : > { %v451_v18 = vadd.f32 %v877_v10, %v450_v17  ;;  %v718_v17 = vld [vmem:[%s1382_s6 + $0x60] sm:$0xff] }
 0x110   : > { %v452_v19 = vpop.f32.mrf.mxu0 }
 0x111   : > { %v467_v22 = vmax.f32 %v451_v18, 0.0  ;;  %v733_v18 = vld [vmem:[%s1382_s6 + $0xd8] sm:$0xff] }
 0x112   : > { %v455_v23 = vpop.f32.mrf.mxu0  ;;  %v717_v19 = vld [vmem:[%s1382_s6 + $0x58] sm:$0xff] }
 0x113   : > { %v456_v24 = vadd.f32 %v877_v10, %v455_v23  ;;  %v934_v25 = vpack.i.bf16 %v467_v22, %v464_v20  ;;  %v715_v23 = vld [vmem:[%s1382_s6 + $0x48] sm:$0xff] }
 0x114   : > { %v457_v26 = vpop.f32.mrf.mxu0 }
 0x115   : > { %v468_v29 = vmax.f32 %v456_v24, 0.0  ;;  %935 = vrot.lane.b32.xlu0 %v934_v25, %s958_s13  ;;  %v730_v24 = vld [vmem:[%s1382_s6 + $0xc0] sm:$0xff]  ;;  %v729_v26 = vld [vmem:[%s1382_s6 + $0xb8] sm:$0xff] }
 0x116   : > { %v460_v30 = vpop.f32.mrf.mxu0  ;;  %v714_v25 = vld [vmem:[%s1382_s6 + $0x40] sm:$0xff] }
 0x117   : > { %v939_v31 = vpack.i.bf16 %v468_v29, %v465_v27  ;;  %v461_v32 = vadd.f32 %v877_v10, %v460_v30  ;;  %v737_v10 = vld [vmem:[%s1382_s6 + $0xf8] sm:$0xff]  ;;  %v727_v30 = vld [vmem:[%s1382_s6 + $0xa8] sm:$0xff] }
 0x118   : > { %v462_v33 = vpop.f32.mrf.mxu0 }
 0x119   : > { %v469_v35 = vmax.f32 %v461_v32, 0.0  ;;  %940 = vrot.lane.b32.xlu0 %v939_v31, %s958_s13  ;;  %v711_v31 = vld [vmem:[%s1382_s6 + $0x28] sm:$0xff]  ;;  %v726_v32 = vld [vmem:[%s1382_s6 + $0xa0] sm:$0xff] }
 0x11a   : > { %v710_v33 = vld [vmem:[%s1382_s6 + $0x20] sm:$0xff] }
 0x11b   : > { %v944_v36 = vpack.i.bf16 %v469_v35, %v466_v34 }
 0x11d   : > { %945 = vrot.lane.b32.xlu1 %v944_v36, %s958_s13  ;;  %v724_v36 = vld [vmem:[%s1382_s6 + $0x90] sm:$0xff] }
 0x187   : > { %v936_v37 = vpop.permute.xlu0 %935 }
 0x188   : > { %v938_v38 = vunpack.i.h.bf16 %v936_v37  ;;  %v937_v39 = vunpack.i.l.bf16 %v936_v37  ;;  %v708_v37 = vld [vmem:[%s1382_s6 + $0x10] sm:$0xff] }
 0x18a   : > { %v497_v40 = vmax.f32 %v467_v22, %v938_v38  ;;  %v494_v41 = vmax.f32 %v464_v20, %v937_v39  ;;  %v732_v20 = vld [vmem:[%s1382_s6 + $0xd0] sm:$0xff]  ;;  %v731_v22 = vld [vmem:[%s1382_s6 + $0xc8] sm:$0xff] }
 0x18b   : > { %v941_v42 = vpop.permute.xlu0 %940  ;;  %v723_v38 = vld [vmem:[%s1382_s6 + $0x88] sm:$0xff] }
 0x18c   : > { %v943_v43 = vunpack.i.h.bf16 %v941_v42  ;;  %v942_v44 = vunpack.i.l.bf16 %v941_v42  ;;  %v500_v45 = vmax.f32 %v494_v41, %v497_v40  ;;  %v707_v39 = vld [vmem:[%s1382_s6 + $0x8] sm:$0xff]  ;;  %v722_v40 = vld [vmem:[%s1382_s6 + $0x80] sm:$0xff] }
 0x18d   : > { %v706_v41 = vld [vmem:[%s1382_s6] sm:$0xff] }
 0x18e   : > { %v498_v46 = vmax.f32 %v468_v29, %v943_v43  ;;  %v495_v47 = vmax.f32 %v465_v27, %v942_v44  ;;  %600 = vmatmul.mubr.f32.vlgmr.msra.gmra.mxu1 %v500_v45  ;;  %v713_v27 = vld [vmem:[%s1382_s6 + $0x38] sm:$0xff]  ;;  %v712_v29 = vld [vmem:[%s1382_s6 + $0x30] sm:$0xff]  ;;  %v885_v45 = vld [vmem:[%s1383_s7] ss:$0 sm:$0xff] }
 0x18f   : > { %v946_v48 = vpop.permute.xlu1 %945  ;;  %605 = vmatprep.mubr.f32.mxu1 %v957_v1 }
 0x190   : > { %v948_v49 = vunpack.i.h.bf16 %v946_v48  ;;  %v947_v50 = vunpack.i.l.bf16 %v946_v48  ;;  %v501_v51 = vmax.f32 %v495_v47, %v498_v46 }
 0x192   : > { %v499_v52 = vmax.f32 %v469_v35, %v948_v49  ;;  %v496_v53 = vmax.f32 %v466_v34, %v947_v50  ;;  %606 = vmatmul.mubr.f32.gmra.mxu1 %v501_v51  ;;  %v725_v34 = vld [vmem:[%s1382_s6 + $0x98] sm:$0xff] }
 0x193   : > { %611 = vmatprep.mubr.f32.mxu1 %v957_v1  ;;  %v709_v35 = vld [vmem:[%s1382_s6 + $0x18] sm:$0xff] }
 0x194   : > { %v502_v54 = vmax.f32 %v496_v53, %v499_v52 }
 0x196   : > { %612 = vmatmul.mubr.f32.gmra.mxu1 %v502_v54 }
 0x197   : > { %699 = vmatprep.mubr.f32.mxu1 %v957_v1  ;;  %v620_v1 = vld [vmem:[%s1380_s4 + $0x10] sm:$0xff] }
 0x24e   : > { %v601_v55 = vpop.f32.mrf.mxu1 }
 0x24f   : > { %v624_v8 = vmul.f32 %v618_v4, %v601_v55 }
 0x250   : > { %v603_v56 = vpop.f32.mrf.mxu1 }
 0x251   : > { %v625_v7 = vmul.f32 %v619_v2, %v603_v56 }
 0x252   : > { %v607_v57 = vpop.f32.mrf.mxu1 }
 0x253   : > { %v626_v6 = vmul.f32 %v620_v1, %v607_v57 }
 0x254   : > { %v609_v58 = vpop.f32.mrf.mxu1 }
 0x255   : > { %v627_v5 = vmul.f32 %v621_v62, %v609_v58 }
 0x256   : > { %v613_v59 = vpop.f32.mrf.mxu1 }
 0x257   : > { %v628_v3 = vmul.f32 %v622_v61, %v613_v59 }
 0x258   : > { %v615_v63 = vpop.f32.mrf.mxu1 }
 0x259   : > { %v629_v0 = vmul.f32 %v623_v60, %v615_v63 }
 0x25b   : > { %661 = vmatprep.subr.mxu1 %v629_v0 }
 0x25c   : > { %662 = vmatpush1.msra.mxu1 %v628_v3 }
 0x25d   : > { %663 = vmatprep.subr.mxu1 %v627_v5 }
 0x25e   : > { %664 = vmatpush1.msra.mxu1 %v626_v6 }
 0x25f   : > { %665 = vmatprep.subr.mxu1 %v625_v7 }
 0x260   : > { %666 = vmatpush1.msra.mxu1 %v624_v8 }
 0x261   : > { %884 = vmatmul.mubr.msk.f32.vlgmr.msra.gmra.mxu1 %vm631_vm1, %v630_v9  ;;  %888 = vmatprep.subr.mxu1 %v737_v10 }
 0x262   : > { %889 = vmatpush3.msra.mxu1 %v721_v11 }
 0x263   : > { %890 = vmatprep.subr.mxu1 %v736_v12 }
 0x264   : > { %891 = vmatpush3.msra.mxu1 %v720_v13 }
 0x265   : > { %892 = vmatprep.subr.mxu1 %v735_v14 }
 0x266   : > { %893 = vmatpush3.msra.mxu1 %v719_v15 }
 0x267   : > { %894 = vmatprep.subr.mxu1 %v734_v16 }
 0x268   : > { %895 = vmatpush3.msra.mxu1 %v718_v17 }
 0x269   : > { %896 = vmatprep.subr.mxu1 %v733_v18 }
 0x26a   : > { %897 = vmatpush3.msra.mxu1 %v717_v19 }
 0x26b   : > { %898 = vmatprep.subr.mxu1 %v732_v20 }
 0x26c   : > { %899 = vmatpush3.msra.mxu1 %v716_v21 }
 0x26d   : > { %900 = vmatprep.subr.mxu1 %v731_v22 }
 0x26e   : > { %901 = vmatpush3.msra.mxu1 %v715_v23 }
 0x26f   : > { %902 = vmatprep.subr.mxu1 %v730_v24 }
 0x270   : > { %903 = vmatpush3.msra.mxu1 %v714_v25 }
 0x271   : > { %904 = vmatprep.subr.mxu1 %v729_v26 }
 0x272   : > { %905 = vmatpush3.msra.mxu1 %v713_v27 }
 0x273   : > { %906 = vmatprep.subr.mxu1 %v728_v28 }
 0x274   : > { %907 = vmatpush3.msra.mxu1 %v712_v29 }
 0x275   : > { %908 = vmatprep.subr.mxu1 %v727_v30 }
 0x276   : > { %909 = vmatpush3.msra.mxu1 %v711_v31 }
 0x277   : > { %910 = vmatprep.subr.mxu1 %v726_v32 }
 0x278   : > { %911 = vmatpush3.msra.mxu1 %v710_v33 }
 0x279   : > { %912 = vmatprep.subr.mxu1 %v725_v34 }
 0x27a   : > { %913 = vmatpush3.msra.mxu1 %v709_v35 }
 0x27b   : > { %914 = vmatprep.subr.mxu1 %v724_v36 }
 0x27c   : > { %915 = vmatpush3.msra.mxu1 %v708_v37 }
 0x27d   : > { %916 = vmatprep.subr.mxu1 %v723_v38 }
 0x27e   : > { %917 = vmatpush3.msra.mxu1 %v707_v39 }
 0x27f   : > { %918 = vmatprep.subr.mxu1 %v722_v40 }
 0x280   : > { %919 = vmatpush3.msra.mxu1 %v706_v41 }
 0x321   : > { %v701_v42 = vpop.f32.mrf.mxu1 }
 0x323   : > { %v703_v43 = vpop.f32.mrf.mxu1 }
 0x324   : > { %809 = vmatprep.mubr.f32.mxu1 %v703_v43 }
 0x325   : > { %810 = vmatmul.mubr.f32.vlgmr.msra.gmra.mxu1 %v701_v42 }
 0x3e5   : > { %v920_v44 = vpop.f32.mrf.mxu1 }
 0x3e7   : > { %v921_v46 = vpop.f32.mrf.mxu1 }
 0x3e8   : > { %v922_v47 = vadd.f32 %v921_v46, %v920_v44 }
 0x3ea   : > { %v812_v48 = vadd.f32 %v922_v47, %v885_v45 }
 0x3ec   : > { %816 = vst.msk [vmem:[%s303_s16] sm:$0x7] %vm815_vm2, %v812_v48 }
 0x3ed PF: > { %s18_s27 = sadd.s32 1, %s955_s27  }
 0x3ee   : > { %p15_p4 = scmp.ge.s32.totalorder %s18_s27, 4  }
 0x3f0   :  { %17 = sbr.rel (!%p15_p4) target bundleno = 1 (0x1), region = 82 }

</bundles_post_ra>
